<compile_context>
chip_gen: v5e
topology: v5e:2x2
jax: 0.10.0
libtpu: 0.0.40
codegen_flags: <defaults>
</compile_context>

<pallas_src>
import jax
import jax.numpy as jnp
from jax.experimental import pallas as pl
from jax.experimental.pallas import tpu as pltpu


def _round_up(x, m):
    return ((x + m - 1) // m) * m


def _vmem_budget_bytes():
    """Per-generation VMEM budget (bytes) with headroom for compiler scratch."""
    phys = 0
    try:
        info = pltpu.get_tpu_info()
        v = getattr(info, "vmem_capacity_bytes", 0)
        if callable(v):
            v = v()
        phys = int(v)
    except Exception:
        phys = 0
    if phys <= 0:
        # Conservative fallback: v7x has 64 MiB per TensorCore (smallest gen).
        phys = 64 * 1024 * 1024
    return int(phys * 0.70)


# ---------------------------------------------------------------------------
# Kernels
# ---------------------------------------------------------------------------
def _linear_kernel_single(x_ref, w_ref, b_ref, o_ref):
    # Whole (padded) K is resident: one MXU pass per (i, j) output tile,
    # bias add fused. x arrives f32, is cast to bf16 in-VMEM so the MXU runs
    # at its native bf16 rate; accumulation is f32.
    x = x_ref[...].astype(jnp.bfloat16)
    o_ref[...] = (
        jnp.dot(x, w_ref[...], preferred_element_type=jnp.float32) + b_ref[...]
    ).astype(o_ref.dtype)


def _linear_kernel_ktiled(x_ref, w_ref, b_ref, o_ref):
    # K is tiled (innermost, "arbitrary"). The output block index is constant
    # across k, so the f32 o_ref stays resident in VMEM and doubles as the
    # accumulator: no scratch, no zero-init pass, no finalize copy.
    k = pl.program_id(2)
    x = x_ref[...].astype(jnp.bfloat16)
    partial = jnp.dot(x, w_ref[...], preferred_element_type=jnp.float32)

    @pl.when(k == 0)
    def _first():
        o_ref[...] = partial + b_ref[...]

    @pl.when(k > 0)
    def _rest():
        o_ref[...] += partial


def pallas_linear_padded(x_p, w_t_p, b_p, *, tm, tn, tk, vmem_limit):
    """y_p = x_p @ w_t_p + b_p on tile-aligned (padded) operands.

    x_p:   [Mp, Kp] f32    (Mp % tm == 0, Kp % tk == 0)
    w_t_p: [Kp, Np] bf16   (pre-transposed, pre-cast; Np % tn == 0)
    b_p:   [1,  Np] f32
    """
    Mp, Kp = x_p.shape
    Kp2, Np = w_t_p.shape
    assert Kp == Kp2
    assert Mp % tm == 0 and Np % tn == 0 and Kp % tk == 0

    if tk == Kp:
        # Single-pass: no K grid axis, no accumulator bookkeeping.
        grid = (Mp // tm, Np // tn)
        kernel = _linear_kernel_single
        in_specs = [
            pl.BlockSpec((tm, Kp), lambda i, j: (i, 0)),
            pl.BlockSpec((Kp, tn), lambda i, j: (0, j)),
            pl.BlockSpec((1, tn), lambda i, j: (0, j)),
        ]
        out_specs = pl.BlockSpec((tm, tn), lambda i, j: (i, j))
        dims = ("parallel", "parallel")
    else:
        # Large-K fallback: K reduction last, output resident across k.
        grid = (Mp // tm, Np // tn, Kp // tk)
        kernel = _linear_kernel_ktiled
        in_specs = [
            pl.BlockSpec((tm, tk), lambda i, j, k: (i, k)),
            pl.BlockSpec((tk, tn), lambda i, j, k: (k, j)),
            pl.BlockSpec((1, tn), lambda i, j, k: (0, j)),
        ]
        out_specs = pl.BlockSpec((tm, tn), lambda i, j, k: (i, j))
        dims = ("parallel", "parallel", "arbitrary")

    return pl.pallas_call(
        kernel,
        out_shape=jax.ShapeDtypeStruct((Mp, Np), jnp.float32),
        grid_spec=pltpu.PrefetchScalarGridSpec(
            num_scalar_prefetch=0,
            grid=grid,
            in_specs=in_specs,
            out_specs=out_specs,
        ),
        compiler_params=pltpu.CompilerParams(
            dimension_semantics=dims,
            vmem_limit_bytes=vmem_limit,
        ),
    )(x_p, w_t_p, b_p)


# ---------------------------------------------------------------------------
# Wrapped module (Pallas-backed nn.Linear) and InertModule
# ---------------------------------------------------------------------------
class InnerLinear:
    """The module wrapped by InertModule (Pallas-backed nn.Linear)."""

    # Fixed tm bucket set: multiples of 16 (bf16 sublane packing), so the
    # number of distinct compiles per layer is bounded, not one per batch size.
    _TM_CANDIDATES = (1024, 512, 256, 128, 64, 32, 16)

    def __init__(self, in_features, out_features, key):
        k_w, k_b = jax.random.split(key)
        bound = 1.0 / (in_features ** 0.5)
        # Deterministic init mimicking nn.Linear's uniform(-1/sqrt(fan_in), .)
        self.weight = jax.random.uniform(
            k_w, (out_features, in_features), jnp.float32, -bound, bound)
        self.bias = jax.random.uniform(
            k_b, (out_features,), jnp.float32, -bound, bound)
        self.in_features = in_features
        self.out_features = out_features

        self._vmem_budget = _vmem_budget_bytes()

        # N tiling: lane-dense, prefer 512/256-wide tiles (v6e/v7x MXU is
        # 256-wide; 128 is the fallback that always divides Np).
        self._Np = _round_up(out_features, 128)
        tn = 128
        for cand in (512, 256, 128):
            if self._Np % cand == 0:
                tn = cand
                break
        self._tn = tn

        # K tiling: keep the whole padded K resident (single-pass kernel) when
        # the worst-case double-buffered working set fits the VMEM budget;
        # otherwise tile K and accumulate into the resident output block.
        Kp0 = _round_up(in_features, 128)
        tm_max, tn_max = self._TM_CANDIDATES[0], 512

        def _working_set(tk):
            # x(f32) + w(bf16) + bias(f32) double-buffered, output(f32) dbl.
            return (2 * (tm_max * tk * 4 + tk * tn_max * 2 + tn_max * 4)
                    + 2 * (tm_max * tn_max * 4))

        if _working_set(Kp0) <= self._vmem_budget:
            self._tk = Kp0
            self._Kp = Kp0
        else:
            tk = 2048
            while tk > 512 and _working_set(tk) > self._vmem_budget:
                tk //= 2
            self._tk = tk
            self._Kp = _round_up(in_features, tk)

        # Hoisted out of the hot path: transpose, zero-pad and bf16-cast the
        # weight exactly once (halves its HBM traffic, native MXU feed).
        self._w_t_pad = jnp.pad(
            self.weight.T,
            ((0, self._Kp - in_features), (0, self._Np - out_features)),
        ).astype(jnp.bfloat16)
        self._b_pad = jnp.pad(
            self.bias.reshape(1, out_features),
            ((0, 0), (0, self._Np - out_features)),
        ).astype(jnp.float32)

    def _select_tiles(self, M):
        Mp16 = _round_up(M, 16)
        tm = 16
        for cand in self._TM_CANDIDATES:
            if cand <= Mp16:
                tm = cand
                break
        tn = self._tn
        # v7x megacore: guarantee >= 2 "parallel" blocks when the problem is
        # big enough to split, so both TensorCores get work.
        if (_round_up(M, tm) // tm) * (self._Np // tn) < 2:
            if tm >= 32:
                tm //= 2
            elif tn >= 256:
                tn //= 2
        return tm, tn

    def __call__(self, x):
        M, K = x.shape
        assert K == self.in_features
        tm, tn = self._select_tiles(M)
        Mp = _round_up(M, tm)

        # Pad only when the shape actually needs it: the aligned fast path has
        # no extra XLA pad/slice ops and no extra HBM round trips for x / y.
        x_in = x
        if Mp != M or self._Kp != K:
            x_in = jnp.pad(x, ((0, Mp - M), (0, self._Kp - K)))

        y = pallas_linear_padded(
            x_in, self._w_t_pad, self._b_pad,
            tm=tm, tn=tn, tk=self._tk, vmem_limit=self._vmem_budget)

        if Mp != M or self._Np != self.out_features:
            y = y[:M, :self.out_features]
        return y


class InertModule:
    """Exact translation of torchsupport InertModule: pure forwarding."""

    def __init__(self, module):
        self.module = module

    def __call__(self, *args, **kwargs):
        return self.module(*args, **kwargs)


if __name__ == "__main__":
    key = jax.random.PRNGKey(0)
    k_x, k_m, k_x2, k_m2 = jax.random.split(key, 4)

    # 1) Small shapes matching typical wrapped-module usage (single tile;
    #    inputs padded up to a lane-dense 128-wide output slab).
    batch, hidden = 8, 32
    x = jax.random.normal(k_x, (batch, hidden), jnp.float32)
    inner = InnerLinear(hidden, hidden, k_m)
    inert = InertModule(inner)
    y = jax.block_until_ready(inert(x))
    y_ref = x @ inner.weight.T + inner.bias
    assert y.shape == (batch, hidden)
    # bf16 operands + f32 accumulation: tolerance loosened accordingly.
    assert jnp.allclose(y, y_ref, atol=5e-2, rtol=5e-2)

    # 2) Larger shapes to exercise the multi-block grid and the
    #    whole-K-resident single-pass path (no per-call pad/slice here).
    M2, K2, N2 = 256, 1024, 512
    x2 = jax.random.normal(k_x2, (M2, K2), jnp.float32)
    inner2 = InnerLinear(K2, N2, k_m2)
    inert2 = InertModule(inner2)
    y2 = jax.block_until_ready(inert2(x2))
    y2_ref = x2 @ inner2.weight.T + inner2.bias
    assert y2.shape == (M2, N2)
    assert jnp.allclose(y2, y2_ref, atol=5e-2, rtol=5e-2)

    print("KERNEL_OK")
</pallas_src>

<mosaic_0001>
module attributes {stable_mosaic.version = 11 : i64} {
  func.func @_linear_kernel_single(%arg0: i32, %arg1: i32, %arg2: memref<16x128xf32, #tpu.memory_space<vmem>>, %arg3: memref<128x128xbf16, #tpu.memory_space<vmem>>, %arg4: memref<1x128xf32, #tpu.memory_space<vmem>>, %arg5: memref<16x128xf32, #tpu.memory_space<vmem>>) attributes {dimension_semantics = [#tpu.dimension_semantics<parallel>, #tpu.dimension_semantics<parallel>], iteration_bounds = array<i64: 1, 1>, scalar_prefetch = 0 : i64, scratch_operands = 0 : i64, tpu.core_type = #tpu.core_type<tc>, window_params = [{transform_indices = @transform_0, window_bounds = array<i64: 16, 128>}, {transform_indices = @transform_1, window_bounds = array<i64: 128, 128>}, {transform_indices = @transform_2, window_bounds = array<i64: 1, 128>}, {transform_indices = @transform_3, window_bounds = array<i64: 16, 128>}]} {
    %c0 = arith.constant 0 : index
    %c0_0 = arith.constant 0 : index
    %0 = vector.load %arg2[%c0, %c0_0] : memref<16x128xf32, #tpu.memory_space<vmem>>, vector<16x128xf32>
    %1 = arith.truncf %0 : vector<16x128xf32> to vector<16x128xbf16>
    %c0_1 = arith.constant 0 : index
    %c0_2 = arith.constant 0 : index
    %2 = vector.load %arg3[%c0_1, %c0_2] : memref<128x128xbf16, #tpu.memory_space<vmem>>, vector<128x128xbf16>
    %cst = arith.constant dense<0.000000e+00> : vector<16x128xf32>
    %3 = tpu.matmul %1, %2, %cst {dimension_numbers = #tpu.dot_dimension_numbers<[1], [0], [0], [1], [0, 0, 1, 1], [], []>} : vector<16x128xbf16>, vector<128x128xbf16>, vector<16x128xf32> -> vector<16x128xf32>
    %c0_3 = arith.constant 0 : index
    %c0_4 = arith.constant 0 : index
    %4 = vector.load %arg4[%c0_3, %c0_4] : memref<1x128xf32, #tpu.memory_space<vmem>>, vector<1x128xf32>
    %5 = vector.broadcast %4 : vector<1x128xf32> to vector<16x128xf32>
    %6 = arith.addf %3, %5 : vector<16x128xf32>
    %c0_5 = arith.constant 0 : index
    %c0_6 = arith.constant 0 : index
    %7 = vector.load %arg5[%c0_5, %c0_6] : memref<16x128xf32, #tpu.memory_space<vmem>>, vector<16x128xf32>
    tpu.vector_store %arg5[%c0_5, %c0_6], %6 {strides = array<i32>} : memref<16x128xf32, #tpu.memory_space<vmem>>, vector<16x128xf32>,
    return
  }
  func.func @transform_0(%arg0: i32, %arg1: i32) -> (i32, i32) {
    %c0_i32 = arith.constant 0 : i32
    %c0_i32_0 = arith.constant 0 : i32
    return %arg0, %c0_i32 : i32, i32
  }
  func.func @transform_1(%arg0: i32, %arg1: i32) -> (i32, i32) {
    %c0_i32 = arith.constant 0 : i32
    %c0_i32_0 = arith.constant 0 : i32
    return %c0_i32, %arg1 : i32, i32
  }
  func.func @transform_2(%arg0: i32, %arg1: i32) -> (i32, i32) {
    %c0_i32 = arith.constant 0 : i32
    %c0_i32_0 = arith.constant 0 : i32
    return %c0_i32, %arg1 : i32, i32
  }
  func.func @transform_3(%arg0: i32, %arg1: i32) -> (i32, i32) {
    %c0_i32 = arith.constant 0 : i32
    return %arg0, %arg1 : i32, i32
  }
}

</mosaic_0001>

<bundles_post_ra>
// kernel: tpu_custom_call.1
= control target key start
LH: loop header
LB: loop body
LE: loop exit
PB: predicated region body
PF: predicated region fallthrough
CT: control target
= control target key end

     0   :  { %8 = vsyncpa [#allocation3], 0  ;;  %s325_s0 = inlined_call_operand.hbm [shape: f32[16,128], index: 0, kind: input, shape index: {}]   ;;  %s326_s1 = inlined_call_operand.hbm [shape: bf16[128,128], index: 1, kind: input, shape index: {}]   ;;  %s327_s2 = inlined_call_operand.vmem [shape: f32[1,128], index: 2, kind: input, shape index: {}]   ;;  %s328_s3 = inlined_call_operand.hbm [shape: f32[16,128], index: 3, kind: output, shape index: {}]  }
   0x1   :  { %9 = vsyncpa [#allocation6], 0 }
   0x2   :  { %10 = vsyncpa [#allocation4], 0  ;;  %s15_s14 = sshll.u32 %s325_s0, 4  ;;  %s280_s15 = smov [#allocation2]   ;;  %s16_s14 = int_to_ptr.hbm [resolvable:$true] %s15_s14 }
   0x3   :  { %s17_s16 = sshll.u32 %s280_s15, 4  ;;  %s28_s19 = sshll.u32 %s326_s1, 4  ;;  %s18_s16 = int_to_ptr.vmem [resolvable:$true] %s17_s16  ;;  %s29_s19 = int_to_ptr.hbm [resolvable:$true] %s28_s19 }
   0x4   :  { %s281_s20 = smov 128   ;;  %s282_s21 = smov 8  }
   0x5   :  { %23 = dma.hbm_to_vmem [thread:$0]  %s16_s14, 256, %s18_s16, [#allocation3], %s281_s20, %s281_s20, %s282_s21  }
   0x6   :  { %s283_s22 = smov [#allocation5]   ;;  %s284_s24 = smov 64  }
   0x7   :  { %s30_s23 = sshll.u32 %s283_s22, 4  ;;  %s285_s0 = smov 4   ;;  %s31_s23 = int_to_ptr.vmem [resolvable:$true] %s30_s23 }
   0x8   :  { %36 = dma.hbm_to_vmem [thread:$0]  %s29_s19, 1024, %s31_s23, [#allocation6], %s284_s24, %s284_s24, %s285_s0  }
   0x9   :  { %274 = dma.done.wait [#allocation3], 256  }
   0xa   :  { %275 = vsyncadd [#allocation3], 4294967040 }
   0xb   :  { %276 = dma.done.wait [#allocation6], 1024  }
   0xc   :  { %277 = vsyncadd [#allocation6], 4294966272  ;;  %v193_v0 = vld [vmem:[#allocation5 + $0x38] sm:$0xff]  ;;  %v192_v1 = vld [vmem:[#allocation5 + $0x30] sm:$0xff]  ;;  %s286_s26 = smov [#allocation7]   ;;  %s140_s30 = sshll.u32 %s328_s3, 4  ;;  %s141_s30 = int_to_ptr.hbm [resolvable:$true] %s140_s30 }
   0xd   :  { %118 = vmatpush.bf16.msra.mxu0 %v193_v0  ;;  %v191_v2 = vld [vmem:[#allocation5 + $0x28] sm:$0xff]  ;;  %v190_v3 = vld [vmem:[#allocation5 + $0x20] sm:$0xff]  ;;  %v189_v4 = vld [vmem:[#allocation5 + $0x18] sm:$0xff]  ;;  %s138_s27 = sshll.u32 %s286_s26, 4  ;;  %s139_s27 = int_to_ptr.vmem [resolvable:$true] %s138_s27 }
   0xe   :  { %v188_v5 = vld [vmem:[#allocation5 + $0x10] sm:$0xff]  ;;  %v187_v6 = vld [vmem:[#allocation5 + $0x8] sm:$0xff]  ;;  %v186_v7 = vld [vmem:[#allocation5] sm:$0xff] }
   0xf   :  { %v47_v8 = vld [vmem:[#allocation2] sm:$0xff]  ;;  %v48_v9 = vld [vmem:[#allocation2 + $0x8] sm:$0xff] }
  0x10   :  { %v49_v10 = vpack.c.bf16 %v48_v9, %v47_v8  ;;  %v201_v11 = vld [vmem:[%s327_s2] ss:$0 sm:$0xff] }
  0x11   :  { %119 = vmatpush.bf16.msra.mxu0 %v192_v1 }
  0x15   :  { %120 = vmatpush.bf16.msra.mxu0 %v191_v2 }
  0x19   :  { %121 = vmatpush.bf16.msra.mxu0 %v190_v3 }
  0x1d   :  { %122 = vmatpush.bf16.msra.mxu0 %v189_v4 }
  0x21   :  { %123 = vmatpush.bf16.msra.mxu0 %v188_v5 }
  0x25   :  { %124 = vmatpush.bf16.msra.mxu0 %v187_v6 }
  0x29   :  { %125 = vmatpush.bf16.msra.mxu0 %v186_v7 }
  0x2c   :  { %126 = vmatmul.bf16.vlgmr.msra.gmra.mxu0 %v49_v10 }
  0xa9   :  { %v127_v12 = vpop.f32.mrf.mxu0 }
  0xaa   :  { %v128_v13 = vadd.f32 %v201_v11, %v127_v12 }
  0xac   :  { %132 = vst [vmem:[#allocation7] sm:$0xff] %v128_v13 }
  0xb1   :  { %v129_v14 = vpop.f32.mrf.mxu0 }
  0xb2   :  { %v130_v15 = vadd.f32 %v201_v11, %v129_v14 }
  0xb4   :  { %133 = vst [vmem:[#allocation7 + $0x8] sm:$0xff] %v130_v15 }
  0xb5   :  { %146 = dma.vmem_to_hbm [thread:$0]  %s139_s27, 256, %s141_s30, [#allocation4], %s281_s20, %s281_s20, %s282_s21  }
  0xb6   :  { %278 = dma.done.wait [#allocation4], 256  }
  0xb7   :  { %279 = vsyncadd [#allocation4], 4294967040 }
  0xb8   :  { %151 = vsyncpa [#allocation3], 1 }
  0xb9   :  { %152 = vsyncpa [#allocation6], 1 }
  0xba   :  { %153 = vsyncpa [#allocation4], 1 }

</bundles_post_ra>
